<compile_context>
chip_gen: v5e
topology: v5e:2x2
jax: 0.10.0
libtpu: 0.0.40
codegen_flags: <defaults>
</compile_context>

<pallas_src>
import functools

import jax
import jax.numpy as jnp
from jax.experimental import pallas as pl
from jax.experimental.pallas import tpu as pltpu


def _contrastive_loss_kernel(t_ref, q_ref, k_ref, out_ref,
                             qt_ref, p_acc, tot_acc, *,
                             g, gs, tm, tn, mxu_dtype):
    """t_ref:   (1, 1) f32 in SMEM, holds 1/sqrt(T).
       q_ref:   (TM, C) query rows (resident across the j sweep).
       k_ref:   (TN, C) key rows (streamed per j step).
       out_ref: (1, TM) per-row loss block (lane-dense), written at last j.
       qt_ref:  (C, TM) scratch: pre-scaled, transposed query block (mxu dtype).
       p_acc / tot_acc: (1, TM) f32 scratch accumulators."""
    i = pl.program_id(0)          # query row-block  (parallel)
    j = pl.program_id(1)          # key  row-block   (arbitrary / reduction)

    inv_sqrt_t = t_ref[0, 0]      # 1/sqrt(T)
    eps2 = jnp.float32(1e-12)     # eps**2 with eps = 1e-6 (CosineSimilarity)

    # ---- once per i-sweep: scale + transpose the query block, zero the accs.
    @pl.when(j == 0)
    def _init():
        q = q_ref[...].astype(jnp.float32)                               # (TM, C)
        q_scale = jax.lax.rsqrt(
            jnp.maximum(jnp.sum(q * q, axis=-1, keepdims=True), eps2)) * inv_sqrt_t
        # Transpose once so the per-step matmul needs no in-loop vxpose.
        qt_ref[...] = jnp.transpose(q * q_scale).astype(mxu_dtype)       # (C, TM)
        p_acc[...] = jnp.zeros_like(p_acc)
        tot_acc[...] = jnp.zeros_like(tot_acc)

    # ---- per step: one streamed key block.
    k = k_ref[...].astype(jnp.float32)                                   # (TN, C)
    k_scale = jax.lax.rsqrt(
        jnp.maximum(jnp.sum(k * k, axis=-1, keepdims=True), eps2)) * inv_sqrt_t
    k_s = (k * k_scale).astype(mxu_dtype)                                # (TN, C)

    # s[r, c] = cos(x[j*TN + r], x[i*TM + c]) / T  (keys on sublanes, queries
    # on lanes -> accumulators and output stay lane-oriented).
    s = jnp.dot(k_s, qt_ref[...], preferred_element_type=jnp.float32)    # (TN, TM)

    kk = j * tn + jax.lax.broadcasted_iota(jnp.int32, (tn, tm), 0)       # key idx
    qq = i * tm + jax.lax.broadcasted_iota(jnp.int32, (tn, tm), 1)       # query idx
    diff = kk - qq

    # e: exp(cos/T) with the diagonal (self-pair) removed.
    e = jnp.where(diff != 0, jnp.exp(s), 0.0)                            # (TN, TM)

    # Positive-pair mask: (kk % gs) == (qq % gs)  <=>  diff in {0, ±gs, .., ±g*gs}.
    pos = diff == 0
    for m in range(1, g + 1):
        pos = pos | (diff == m * gs) | (diff == -m * gs)
    e_pos = jnp.where(pos, e, 0.0)

    p_acc[...] += jnp.sum(e_pos, axis=0, keepdims=True)                  # (1, TM)
    tot_acc[...] += jnp.sum(e, axis=0, keepdims=True)                    # (1, TM)

    # ---- finalize: -log(p / (n + p)) == log(total) - log(p)
    @pl.when(j == pl.num_programs(1) - 1)
    def _finalize():
        out_ref[...] = jnp.log(tot_acc[...]) - jnp.log(p_acc[...])


def _pick_tile(b):
    # 256-aligned tiles hit the full 2x(256x256) MXU on v6e/v7x and are still
    # 128-multiples for v5e's 4x(128x128) MXU; otherwise fall back to one block.
    for t in (512, 256, 128):
        if b % t == 0:
            return t
    return b


def contrastive_loss(x, *, g=1, param_t=-2.079, mxu_dtype=jnp.bfloat16):
    """JAX/Pallas equivalent of ContrastiveLoss(g=g).forward(x)."""
    B, C = x.shape
    assert g > 0, f"Invalid value g={g}"
    assert B % (g + 1) == 0, "batch_size is not match g"
    gs = B // (g + 1)

    # T = sigmoid(param_t) * 4.5 + 0.5.  Pass 1/sqrt(T) so it folds into the
    # per-row normalization scale (the MXU then produces cos/T directly).
    t = jax.nn.sigmoid(jnp.float32(param_t)) * jnp.float32(4.5) + jnp.float32(0.5)
    inv_sqrt_t = jax.lax.rsqrt(t).reshape(1, 1).astype(jnp.float32)

    tm = _pick_tile(B)
    tn = _pick_tile(B)
    grid = (B // tm, B // tn)

    kernel = functools.partial(_contrastive_loss_kernel,
                               g=g, gs=gs, tm=tm, tn=tn, mxu_dtype=mxu_dtype)

    per_row = pl.pallas_call(
        kernel,
        out_shape=jax.ShapeDtypeStruct((1, B), jnp.float32),   # lane-dense losses
        grid=grid,
        in_specs=[
            pl.BlockSpec(memory_space=pltpu.MemorySpace.SMEM),   # 1/sqrt(T)
            pl.BlockSpec((tm, C), lambda i, j: (i, 0)),          # query rows
            pl.BlockSpec((tn, C), lambda i, j: (j, 0)),          # key rows (streamed)
        ],
        out_specs=pl.BlockSpec((1, tm), lambda i, j: (0, i)),
        scratch_shapes=[
            pltpu.VMEM((C, tm), mxu_dtype),     # pre-scaled, transposed queries
            pltpu.VMEM((1, tm), jnp.float32),   # positive-pair sums (p)
            pltpu.VMEM((1, tm), jnp.float32),   # all-pair sums (p + n)
        ],
        compiler_params=pltpu.CompilerParams(
            dimension_semantics=("parallel", "arbitrary"),
            vmem_limit_bytes=48 * 1024 * 1024,   # raised vs default, < v7x physical
        ),
    )(inv_sqrt_t, x, x)

    return jnp.mean(per_row)


def _reference_loss(x, *, g=1, param_t=-2.079):
    """Pure-JAX f32 reference mirroring the PyTorch forward (for validation)."""
    B, _ = x.shape
    gs = B // (g + 1)
    t = jax.nn.sigmoid(jnp.float32(param_t)) * 4.5 + 0.5
    eps = 1e-6
    xf = x.astype(jnp.float32)
    norm = jnp.maximum(jnp.linalg.norm(xf, axis=-1, keepdims=True), eps)
    xn = xf / norm
    cos = xn @ xn.T
    measure = jnp.exp(cos / t) * (1.0 - jnp.eye(B, dtype=jnp.float32))
    mask = jnp.tile(jnp.eye(gs, dtype=jnp.float32), (g + 1, g + 1))
    p = jnp.sum(mask * measure, axis=-1)
    n = jnp.sum((1.0 - mask) * measure, axis=-1)
    return jnp.mean(-jnp.log(p / (n + p)))


if __name__ == "__main__":
    key = jax.random.PRNGKey(0)
    k_small, k_big = jax.random.split(key)

    # Small single-block case: g=1 -> batch divisible by 2; B=8, C=32.
    x_small = jax.random.normal(k_small, (8, 32), dtype=jnp.float32)
    loss_small = jax.block_until_ready(contrastive_loss(x_small, g=1))
    ref_small = _reference_loss(x_small, g=1)
    # bf16 MXU operands (f32 accumulation) -> loosen tolerance vs f32 reference.
    assert jnp.allclose(loss_small, ref_small, rtol=2e-2, atol=1e-2), (loss_small, ref_small)

    # Multi-block case exercising the (parallel, arbitrary) grid: B=384 -> 3x3 tiles of 128.
    x_big = jax.random.normal(k_big, (384, 64), dtype=jnp.float32)
    loss_big = jax.block_until_ready(contrastive_loss(x_big, g=1))
    ref_big = _reference_loss(x_big, g=1)
    assert jnp.allclose(loss_big, ref_big, rtol=2e-2, atol=1e-2), (loss_big, ref_big)

    print("KERNEL_OK")
</pallas_src>

<mosaic_0001>
module attributes {stable_mosaic.version = 11 : i64} {
  func.func @_contrastive_loss_kernel(%arg0: i32, %arg1: i32, %arg2: memref<1x1xf32, #tpu.memory_space<smem>>, %arg3: memref<8x32xf32, #tpu.memory_space<vmem>>, %arg4: memref<8x32xf32, #tpu.memory_space<vmem>>, %arg5: memref<1x8xf32, #tpu.memory_space<vmem>>, %arg6: memref<32x8xbf16, #tpu.memory_space<vmem>>, %arg7: memref<1x8xf32, #tpu.memory_space<vmem>>, %arg8: memref<1x8xf32, #tpu.memory_space<vmem>>) attributes {dimension_semantics = [#tpu.dimension_semantics<parallel>, #tpu.dimension_semantics<arbitrary>], iteration_bounds = array<i64: 1, 1>, scalar_prefetch = 0 : i64, scratch_operands = 3 : i64, tpu.core_type = #tpu.core_type<tc>, window_params = [{transform_indices = @transform_0, window_bounds = array<i64: 1, 1>}, {transform_indices = @transform_1, window_bounds = array<i64: 8, 32>}, {transform_indices = @transform_2, window_bounds = array<i64: 8, 32>}, {transform_indices = @transform_3, window_bounds = array<i64: 1, 8>}]} {
    %c0 = arith.constant 0 : index
    %c0_0 = arith.constant 0 : index
    %0 = memref.load %arg2[%c0, %c0_0] : memref<1x1xf32, #tpu.memory_space<smem>>
    %c0_i32 = arith.constant 0 : i32
    %1 = arith.cmpi eq, %arg1, %c0_i32 : i32
    %2 = arith.extui %1 : i1 to i32
    %cst = arith.constant 9.99999996E-13 : f32
    %c0_i32_1 = arith.constant 0 : i32
    %3 = arith.cmpi ne, %2, %c0_i32_1 : i32
    scf.if %3 {
      %c0_26 = arith.constant 0 : index
      %c0_27 = arith.constant 0 : index
      %55 = vector.load %arg3[%c0_26, %c0_27] : memref<8x32xf32, #tpu.memory_space<vmem>>, vector<8x32xf32>
      %56 = arith.mulf %55, %55 : vector<8x32xf32>
      %cst_28 = arith.constant dense<0.000000e+00> : vector<8xf32>
      %57 = vector.multi_reduction <add>, %56, %cst_28 [1] : vector<8x32xf32> to vector<8xf32>
      %58 = vector.shape_cast %57 : vector<8xf32> to vector<8x1xf32>
      %59 = vector.broadcast %cst : f32 to vector<8x1xf32>
      %60 = arith.maximumf %58, %59 : vector<8x1xf32>
      %61 = math.rsqrt %60 : vector<8x1xf32>
      %62 = vector.broadcast %0 : f32 to vector<8x1xf32>
      %63 = arith.mulf %61, %62 : vector<8x1xf32>
      %64 = vector.broadcast %63 : vector<8x1xf32> to vector<8x32xf32>
      %65 = arith.mulf %55, %64 : vector<8x32xf32>
      %66 = tpu.transpose %65, [1, 0] : vector<8x32xf32> -> vector<32x8xf32>
      %67 = arith.truncf %66 : vector<32x8xf32> to vector<32x8xbf16>
      %c0_29 = arith.constant 0 : index
      %c0_30 = arith.constant 0 : index
      %68 = vector.load %arg6[%c0_29, %c0_30] : memref<32x8xbf16, #tpu.memory_space<vmem>>, vector<32x8xbf16>
      tpu.vector_store %arg6[%c0_29, %c0_30], %67 {strides = array<i32>} : memref<32x8xbf16, #tpu.memory_space<vmem>>, vector<32x8xbf16>,
      %cst_31 = arith.constant 0.000000e+00 : f32
      %69 = vector.broadcast %cst_31 : f32 to vector<1x8xf32>
      %c0_32 = arith.constant 0 : index
      %c0_33 = arith.constant 0 : index
      %70 = vector.load %arg7[%c0_32, %c0_33] : memref<1x8xf32, #tpu.memory_space<vmem>>, vector<1x8xf32>
      tpu.vector_store %arg7[%c0_32, %c0_33], %69 {strides = array<i32>} : memref<1x8xf32, #tpu.memory_space<vmem>>, vector<1x8xf32>,
      %cst_34 = arith.constant 0.000000e+00 : f32
      %71 = vector.broadcast %cst_34 : f32 to vector<1x8xf32>
      %c0_35 = arith.constant 0 : index
      %c0_36 = arith.constant 0 : index
      %72 = vector.load %arg8[%c0_35, %c0_36] : memref<1x8xf32, #tpu.memory_space<vmem>>, vector<1x8xf32>
      tpu.vector_store %arg8[%c0_35, %c0_36], %71 {strides = array<i32>} : memref<1x8xf32, #tpu.memory_space<vmem>>, vector<1x8xf32>,
    } else {
    }
    %c0_2 = arith.constant 0 : index
    %c0_3 = arith.constant 0 : index
    %4 = vector.load %arg4[%c0_2, %c0_3] : memref<8x32xf32, #tpu.memory_space<vmem>>, vector<8x32xf32>
    %5 = arith.mulf %4, %4 : vector<8x32xf32>
    %cst_4 = arith.constant dense<0.000000e+00> : vector<8xf32>
    %6 = vector.multi_reduction <add>, %5, %cst_4 [1] : vector<8x32xf32> to vector<8xf32>
    %7 = vector.shape_cast %6 : vector<8xf32> to vector<8x1xf32>
    %cst_5 = arith.constant 9.99999996E-13 : f32
    %8 = vector.broadcast %cst_5 : f32 to vector<8x1xf32>
    %9 = arith.maximumf %7, %8 : vector<8x1xf32>
    %10 = math.rsqrt %9 : vector<8x1xf32>
    %11 = vector.broadcast %0 : f32 to vector<8x1xf32>
    %12 = arith.mulf %10, %11 : vector<8x1xf32>
    %13 = vector.broadcast %12 : vector<8x1xf32> to vector<8x32xf32>
    %14 = arith.mulf %4, %13 : vector<8x32xf32>
    %15 = arith.truncf %14 : vector<8x32xf32> to vector<8x32xbf16>
    %c0_6 = arith.constant 0 : index
    %c0_7 = arith.constant 0 : index
    %16 = vector.load %arg6[%c0_6, %c0_7] : memref<32x8xbf16, #tpu.memory_space<vmem>>, vector<32x8xbf16>
    %cst_8 = arith.constant dense<0.000000e+00> : vector<8x8xf32>
    %17 = tpu.matmul %15, %16, %cst_8 {dimension_numbers = #tpu.dot_dimension_numbers<[1], [0], [0], [1], [0, 0, 1, 1], [], []>} : vector<8x32xbf16>, vector<32x8xbf16>, vector<8x8xf32> -> vector<8x8xf32>
    %c8_i32 = arith.constant 8 : i32
    %18 = arith.muli %arg1, %c8_i32 : i32
    %19 = tpu.iota {dimensions = array<i32: 0>} : vector<8x8xi32>
    %20 = vector.broadcast %18 : i32 to vector<8x8xi32>
    %21 = arith.addi %20, %19 : vector<8x8xi32>
    %c8_i32_9 = arith.constant 8 : i32
    %22 = arith.muli %arg0, %c8_i32_9 : i32
    %23 = tpu.iota {dimensions = array<i32: 1>} : vector<8x8xi32>
    %24 = vector.broadcast %22 : i32 to vector<8x8xi32>
    %25 = arith.addi %24, %23 : vector<8x8xi32>
    %26 = arith.subi %21, %25 : vector<8x8xi32>
    %c0_i32_10 = arith.constant 0 : i32
    %27 = vector.broadcast %c0_i32_10 : i32 to vector<8x8xi32>
    %28 = arith.cmpi ne, %26, %27 : vector<8x8xi32>
    %29 = math.exp %17 : vector<8x8xf32>
    %cst_11 = arith.constant 0.000000e+00 : f32
    %30 = vector.broadcast %cst_11 : f32 to vector<8x8xf32>
    %31 = arith.select %28, %29, %30 : vector<8x8xi1>, vector<8x8xf32>
    %c0_i32_12 = arith.constant 0 : i32
    %32 = vector.broadcast %c0_i32_12 : i32 to vector<8x8xi32>
    %33 = arith.cmpi eq, %26, %32 : vector<8x8xi32>
    %c4_i32 = arith.constant 4 : i32
    %34 = vector.broadcast %c4_i32 : i32 to vector<8x8xi32>
    %35 = arith.cmpi eq, %26, %34 : vector<8x8xi32>
    %36 = arith.ori %33, %35 : vector<8x8xi1>
    %c-4_i32 = arith.constant -4 : i32
    %37 = vector.broadcast %c-4_i32 : i32 to vector<8x8xi32>
    %38 = arith.cmpi eq, %26, %37 : vector<8x8xi32>
    %39 = arith.ori %36, %38 : vector<8x8xi1>
    %cst_13 = arith.constant 0.000000e+00 : f32
    %40 = vector.broadcast %cst_13 : f32 to vector<8x8xf32>
    %41 = arith.select %39, %31, %40 : vector<8x8xi1>, vector<8x8xf32>
    %c0_14 = arith.constant 0 : index
    %c0_15 = arith.constant 0 : index
    %42 = vector.load %arg7[%c0_14, %c0_15] : memref<1x8xf32, #tpu.memory_space<vmem>>, vector<1x8xf32>
    %cst_16 = arith.constant dense<0.000000e+00> : vector<8xf32>
    %43 = vector.multi_reduction <add>, %41, %cst_16 [0] : vector<8x8xf32> to vector<8xf32>
    %44 = vector.shape_cast %43 : vector<8xf32> to vector<1x8xf32>
    %45 = arith.addf %42, %44 : vector<1x8xf32>
    %c0_17 = arith.constant 0 : index
    %c0_18 = arith.constant 0 : index
    %46 = vector.load %arg7[%c0_17, %c0_18] : memref<1x8xf32, #tpu.memory_space<vmem>>, vector<1x8xf32>
    tpu.vector_store %arg7[%c0_17, %c0_18], %45 {strides = array<i32>} : memref<1x8xf32, #tpu.memory_space<vmem>>, vector<1x8xf32>,
    %c0_19 = arith.constant 0 : index
    %c0_20 = arith.constant 0 : index
    %47 = vector.load %arg8[%c0_19, %c0_20] : memref<1x8xf32, #tpu.memory_space<vmem>>, vector<1x8xf32>
    %cst_21 = arith.constant dense<0.000000e+00> : vector<8xf32>
    %48 = vector.multi_reduction <add>, %31, %cst_21 [0] : vector<8x8xf32> to vector<8xf32>
    %49 = vector.shape_cast %48 : vector<8xf32> to vector<1x8xf32>
    %50 = arith.addf %47, %49 : vector<1x8xf32>
    %c0_22 = arith.constant 0 : index
    %c0_23 = arith.constant 0 : index
    %51 = vector.load %arg8[%c0_22, %c0_23] : memref<1x8xf32, #tpu.memory_space<vmem>>, vector<1x8xf32>
    tpu.vector_store %arg8[%c0_22, %c0_23], %50 {strides = array<i32>} : memref<1x8xf32, #tpu.memory_space<vmem>>, vector<1x8xf32>,
    %c0_i32_24 = arith.constant 0 : i32
    %52 = arith.cmpi eq, %arg1, %c0_i32_24 : i32
    %53 = arith.extui %52 : i1 to i32
    %c0_i32_25 = arith.constant 0 : i32
    %54 = arith.cmpi ne, %53, %c0_i32_25 : i32
    scf.if %54 {
      %c0_26 = arith.constant 0 : index
      %c0_27 = arith.constant 0 : index
      %55 = vector.load %arg8[%c0_26, %c0_27] : memref<1x8xf32, #tpu.memory_space<vmem>>, vector<1x8xf32>
      %56 = math.log %55 : vector<1x8xf32>
      %c0_28 = arith.constant 0 : index
      %c0_29 = arith.constant 0 : index
      %57 = vector.load %arg7[%c0_28, %c0_29] : memref<1x8xf32, #tpu.memory_space<vmem>>, vector<1x8xf32>
      %58 = math.log %57 : vector<1x8xf32>
      %59 = arith.subf %56, %58 : vector<1x8xf32>
      %c0_30 = arith.constant 0 : index
      %c0_31 = arith.constant 0 : index
      %60 = vector.load %arg5[%c0_30, %c0_31] : memref<1x8xf32, #tpu.memory_space<vmem>>, vector<1x8xf32>
      tpu.vector_store %arg5[%c0_30, %c0_31], %59 {strides = array<i32>} : memref<1x8xf32, #tpu.memory_space<vmem>>, vector<1x8xf32>,
    } else {
    }
    return
  }
  func.func @transform_0(%arg0: i32, %arg1: i32) -> (i32, i32) {
    %c0_i32 = arith.constant 0 : i32
    %c0_i32_0 = arith.constant 0 : i32
    %c0_i32_1 = arith.constant 0 : i32
    return %c0_i32, %c0_i32_0 : i32, i32
  }
  func.func @transform_1(%arg0: i32, %arg1: i32) -> (i32, i32) {
    %c0_i32 = arith.constant 0 : i32
    %c0_i32_0 = arith.constant 0 : i32
    return %arg0, %c0_i32 : i32, i32
  }
  func.func @transform_2(%arg0: i32, %arg1: i32) -> (i32, i32) {
    %c0_i32 = arith.constant 0 : i32
    %c0_i32_0 = arith.constant 0 : i32
    return %arg1, %c0_i32 : i32, i32
  }
  func.func @transform_3(%arg0: i32, %arg1: i32) -> (i32, i32) {
    %c0_i32 = arith.constant 0 : i32
    %c0_i32_0 = arith.constant 0 : i32
    return %c0_i32, %arg0 : i32, i32
  }
}

</mosaic_0001>

<bundles_post_ra>
// kernel: tpu_custom_call.1
= control target key start
LH: loop header
LB: loop body
LE: loop exit
PB: predicated region body
PF: predicated region fallthrough
CT: control target
= control target key end

     0   :  { %9 = vsyncpa [#allocation7], 0  ;;  %s390_s0 = inlined_call_operand.<no memory space> [shape: f32[1,1], index: 0, kind: input, shape index: {}]   ;;  %s391_s1 = inlined_call_operand.hbm [shape: f32[8,32], index: 1, kind: input, shape index: {}]   ;;  %s392_s2 = inlined_call_operand.hbm [shape: f32[8,32], index: 2, kind: input, shape index: {}]   ;;  %s393_s3 = inlined_call_operand.hbm [shape: f32[1,8], index: 3, kind: output, shape index: {}]  }
   0x1   :  { %10 = vsyncpa [#allocation10], 0 }
   0x2   :  { %11 = vsyncpa [#allocation8], 0  ;;  %s19_s14 = sshll.u32 %s391_s1, 4  ;;  %s342_s15 = smov [#allocation6]   ;;  %s20_s14 = int_to_ptr.hbm [resolvable:$true] %s19_s14 }
   0x3   :  { %s21_s16 = sshll.u32 %s342_s15, 4  ;;  %s30_s19 = sshll.u32 %s392_s2, 4  ;;  %s22_s16 = int_to_ptr.vmem [resolvable:$true] %s21_s16  ;;  %s31_s19 = int_to_ptr.hbm [resolvable:$true] %s30_s19 }
   0x4   :  { %24 = dma.hbm_to_vmem [thread:$0]  %s20_s14, 128, %s22_s16, [#allocation7]  }
   0x5   :  { %s343_s20 = smov [#allocation9]  }
   0x6   :  { %s32_s21 = sshll.u32 %s343_s20, 4  ;;  %s33_s21 = int_to_ptr.vmem [resolvable:$true] %s32_s21 }
   0x7   :  { %35 = dma.hbm_to_vmem [thread:$0]  %s31_s19, 128, %s33_s21, [#allocation10]  }
   0x8   :  { %336 = dma.done.wait [#allocation7], 128  }
   0x9   :  { %337 = vsyncadd [#allocation7], 4294967168 }
   0xa   :  { %338 = dma.done.wait [#allocation10], 128  }
   0xb   :  { %339 = vsyncadd [#allocation10], 4294967168  ;;  %v50_v0 = vld [vmem:[#allocation6] sm:$0xff]  ;;  %vm52_vm0 = vcmask 261120   ;;  %v114_v3 = vld [vmem:[#allocation9] sm:$0xff]  ;;  %v67_v14 = vstv %s390_s0  ;;  %vm106_vm4 = vcmask 60416   ;;  %v168_v41 = vlaneseq }
   0xc   :  { %v51_v1 = vmul.f32 %v50_v0, %v50_v0  ;;  %v115_v4 = vmul.f32 %v114_v3, %v114_v3  ;;  %vm111_vm8 = vcmask 57344   ;;  %v344_v40 = vmov 0.0   ;;  %s345_s0 = smov [#allocation11]   ;;  %s228_s25 = sshll.u32 %s393_s3, 4  ;;  %s229_s25 = int_to_ptr.hbm [resolvable:$true] %s228_s25 }
   0xd   :  { %112 = vst.msk [vmem:[#allocation3] sm:$0x1] %vm111_vm8, %v344_v40  ;;  %v169_v42 = vshrl.u32 %v168_v41, 7  ;;  %v174_v43 = vand.u32 127, %v168_v41  ;;  %vm189_vm15 = vcmask 64512   ;;  %s226_s22 = sshll.u32 %s345_s0, 4  ;;  %s227_s22 = int_to_ptr.vmem [resolvable:$true] %s226_s22 }
   0xe   :  { %v53_v2 = vsel %vm52_vm0, %v51_v1, 0.0  ;;  %v117_v5 = vsel %vm52_vm0, %v115_v4, 0.0  ;;  %113 = vst.msk [vmem:[#allocation4] sm:$0x1] %vm111_vm8, %v344_v40 }
   0xf   :  { %54 = vadd.xlane.f32.xlu0 %v53_v2  ;;  %v177_v44 = vsub.s32 %v169_v42, %v174_v43 }
  0x11   :  { %vm182_vm9 = vcmp.eq.s32.totalorder %v177_v44, 0  ;;  %vm183_vm10 = vcmp.eq.s32.totalorder %v177_v44, 4  ;;  %vm185_vm12 = vcmp.eq.s32.totalorder %v177_v44, 4294967292  ;;  %vm178_vm13 = vcmp.ne.s32.totalorder %v177_v44, 0 }
  0x12   :  { %vm184_vm11 = vmor %vm182_vm9, %vm183_vm10 }
  0x13   :  { %vm186_vm14 = vmor %vm184_vm11, %vm185_vm12 }
  0x14   :  { %v188_v1 = vld [vmem:[#allocation3] sm:$0x1] }
  0x15   :  { %v200_v63 = vld [vmem:[#allocation4] sm:$0x1] }
  0x17   :  { %118 = vadd.xlane.f32.xlu0 %v117_v5 }
  0x82   :  { %v55_v6 = vpop.xlane.xlu0 %54 }
  0x83   :  { %v56_v7 = vmax.f32 %v55_v6, 1e-12 }
  0x85   :  { %254 = vrsqrt.f32 %v56_v7  ;;  %vm63_vm2 = vweird.f32 %v56_v7 }
  0x8a   :  { %v119_v18 = vpop.xlane.xlu0 %118 }
  0x8b   :  { %v255_v8 = vpop.eup %254  ;;  %v120_v19 = vmax.f32 %v119_v18, 1e-12 }
  0x8c   :  { %v58_v9 = vmul.f32 %v255_v8, %v56_v7  ;;  %vm64_vm1 = vweird.f32 %v255_v8 }
  0x8d   :  { %vm65_vm3 = vmor %vm63_vm2, %vm64_vm1  ;;  %256 = vrsqrt.f32 %v120_v19  ;;  %vm127_vm5 = vweird.f32 %v120_v19 }
  0x8e   :  { %v59_v10 = vmul.f32 %v255_v8, %v58_v9 }
  0x90   :  { %v60_v11 = vmul.f32 0.5, %v59_v10 }
  0x92   :  { %v61_v12 = vsub.f32 1.5, %v60_v11 }
  0x93   :  { %v257_v22 = vpop.eup %256 }
  0x94   :  { %v62_v13 = vmul.f32 %v255_v8, %v61_v12  ;;  %v122_v25 = vmul.f32 %v257_v22, %v120_v19  ;;  %vm128_vm6 = vweird.f32 %v257_v22 }
  0x95   :  { %vm129_vm7 = vmor %vm127_vm5, %vm128_vm6 }
  0x96   :  { %v66_v15 = vsel %vm65_vm3, %v255_v8, %v62_v13  ;;  %v123_v26 = vmul.f32 %v257_v22, %v122_v25 }
  0x97   :  { %v68_v16 = vmul.f32 %v67_v14, %v66_v15 }
  0x98   :  { %v124_v29 = vmul.f32 0.5, %v123_v26 }
  0x99   :  { %v69_v17 = vmul.f32 %v68_v16, %v50_v0 }
  0x9a   :  { %v125_v30 = vsub.f32 1.5, %v124_v29 }
  0x9b   :  { %70 = vxpose.xlu1.b32.start.end [1/1] (short) (narrow) %v69_v17, 32 }
  0x9c   :  { %v126_v33 = vmul.f32 %v257_v22, %v125_v30 }
  0x9e   :  { %v130_v34 = vsel %vm129_vm7, %v257_v22, %v126_v33 }
  0x9f   :  { %v132_v35 = vmul.f32 %v130_v34, %v67_v14 }
  0xa1   :  { %v133_v37 = vmul.f32 %v132_v35, %v114_v3 }
  0xa3   :  { %v134_v39 = vpack.c.bf16 %v133_v37, %v133_v37 }
 0x13f   :  { %v86_v20 = vpop.trf.xlu1 }
 0x140   :  { %v102_v21 = vpack.c.bf16 %v86_v20, %v86_v20 }
 0x142   :  { %107 = vst.msk [vmem:[#allocation2] sm:$0xf] %vm106_vm4, %v102_v21 }
 0x147   :  { %v87_v23 = vpop.trf.xlu1 }
 0x148   :  { %v103_v24 = vpack.c.bf16 %v87_v23, %v87_v23 }
 0x14a   :  { %108 = vst.msk [vmem:[#allocation2 + $0x4] sm:$0xf] %vm106_vm4, %v103_v24 }
 0x14f   :  { %v88_v27 = vpop.trf.xlu1 }
 0x150   :  { %v104_v28 = vpack.c.bf16 %v88_v27, %v88_v27 }
 0x151   :  { %v248_v38 = vld [vmem:[#allocation2] sm:$0xff] }
 0x152   :  { %109 = vst.msk [vmem:[#allocation2 + $0x8] sm:$0xf] %vm106_vm4, %v104_v28 }
 0x157   :  { %v89_v31 = vpop.trf.xlu1 }
 0x158   :  { %v105_v32 = vpack.c.bf16 %v89_v31, %v89_v31 }
 0x15a   :  { %110 = vst.msk [vmem:[#allocation2 + $0xc] sm:$0xf] %vm106_vm4, %v105_v32 }
 0x161   :  { %v249_v36 = vld [vmem:[#allocation2 + $0x8] sm:$0xff] }
 0x162   :  { %160 = vmatpush.bf16.msra.mxu0 %v249_v36 }
 0x166   :  { %161 = vmatpush.bf16.msra.mxu0 %v248_v38 }
 0x169   :  { %247 = vmatmul.msk.bf16.vlgmr.msra.gmra.mxu0 %vm52_vm0, %v134_v39 }
 0x1e6   :  { %v163_v45 = vpop.f32.mrf.mxu0 }
 0x1e7   :  { %v179_v46 = vmul.f32 1.442695, %v163_v45 }
 0x1e9   :  { %258 = vpow2.f32 %v179_v46 }
 0x1ee   :  { %v165_v47 = vpop.f32.mrf.mxu0 }
 0x1ef   :  { %v259_v48 = vpop.eup %258 }
 0x1f0   :  { %v181_v49 = vsel %vm178_vm13, %v259_v48, 0.0 }
 0x1f1   :  { %v187_v50 = vsel %vm186_vm14, %v181_v49, 0.0  ;;  %v201_v51 = vsel %vm189_vm15, %v181_v49, 0.0 }
 0x1f2   :  { %v190_v52 = vsel %vm189_vm15, %v187_v50, 0.0  ;;  %v202_v53 = vrot.slane %v201_v51, 4 }
 0x1f3   :  { %v191_v54 = vrot.slane %v190_v52, 4 }
 0x1f4   :  { %v203_v55 = vadd.f32 %v202_v53, %v201_v51 }
 0x1f5   :  { %v192_v56 = vadd.f32 %v191_v54, %v190_v52 }
 0x1f6   :  { %v204_v57 = vrot.slane %v203_v55, 2 }
 0x1f7   :  { %v193_v58 = vrot.slane %v192_v56, 2 }
 0x1f8   :  { %v205_v59 = vadd.f32 %v204_v57, %v203_v55 }
 0x1f9   :  { %v194_v60 = vadd.f32 %v193_v58, %v192_v56 }
 0x1fa   :  { %v206_v61 = vrot.slane %v205_v59, 1 }
 0x1fb   :  { %v195_v62 = vrot.slane %v194_v60, 1 }
 0x1fc   :  { %v207_v0 = vadd.f32 %v206_v61, %v205_v59 }
 0x1fd   :  { %v196_v2 = vadd.f32 %v195_v62, %v194_v60 }
 0x1fe   :  { %v208_v3 = vadd.f32 %v207_v0, %v200_v63 }
 0x1ff   :  { %v197_v4 = vadd.f32 %v196_v2, %v188_v1 }
 0x200   :  { %209 = vst.msk [vmem:[#allocation4] sm:$0x1] %vm111_vm8, %v208_v3 }
 0x201   :  { %199 = vst.msk [vmem:[#allocation3] sm:$0x1] %vm111_vm8, %v197_v4 }
 0x207   :  { %v213_v5 = vld [vmem:[#allocation4] sm:$0x1] }
 0x208   :  { %260 = vlog2.f32 %v213_v5  ;;  %v216_v6 = vld [vmem:[#allocation3] sm:$0x1] }
 0x209   :  { %262 = vlog2.f32 %v216_v6 }
 0x20e   :  { %v261_v7 = vpop.eup %260 }
 0x20f   :  { %v263_v8 = vpop.eup %262  ;;  %v215_v9 = vmul.f32 0.6931472, %v261_v7 }
 0x210   :  { %v218_v10 = vmul.f32 0.6931472, %v263_v8 }
 0x212   :  { %v219_v11 = vsub.f32 %v215_v9, %v218_v10 }
 0x214   :  { %220 = vst.msk [vmem:[#allocation11] sm:$0x1] %vm111_vm8, %v219_v11 }
 0x215   :  { %231 = dma.vmem_to_hbm [thread:$0]  %s227_s22, 16, %s229_s25, [#allocation8]  }
 0x216   :  { %340 = dma.done.wait [#allocation8], 16  }
 0x217   :  { %341 = vsyncadd [#allocation8], 4294967280 }
 0x218   :  { %236 = vsyncpa [#allocation7], 1 }
 0x219   :  { %237 = vsyncpa [#allocation10], 1 }
 0x21a   :  { %238 = vsyncpa [#allocation8], 1 }

</bundles_post_ra>
